<compile_context>
chip_gen: v7x
topology: tpu7x:2x2x1
jax: 0.10.0
libtpu: 0.0.40
codegen_flags: <defaults>
</compile_context>

<pallas_src>
import jax
import jax.numpy as jnp
from jax import lax
from jax.experimental import pallas as pl
from jax.experimental.pallas import tpu as pltpu


_VMEM_LIMIT_BYTES = 48 * 1024 * 1024   # explicitly raised (v5e default 16 MiB); < v7x 64 MiB physical
_TILE_BUDGET_BYTES = 36 * 1024 * 1024  # buffer budget, leaves headroom for compiler scratch

# contract the last (spatial) dim of both operands: F @ F.T without a transpose
_NT_DIMS = (((1,), (1,)), ((), ()))


def _round_up(x, m):
    return -(-x // m) * m


def _pick_tm(bf):
    """Row-block size for the Gram output. Single block for small BF; for large
    BF split rows (multiple of 8, <= 512) so v7x's two TensorCores share work."""
    if bf <= 256:
        return bf
    for tm in range(min(512, bf - 1), 7, -1):
        if tm % 8 == 0 and bf % tm == 0:
            return tm
    return bf


def _pick_tk(bf, tm, hw, itemsize, with_target, two_inputs, max_tk=None):
    """Largest K tile (multiple of 128) that fits the VMEM budget with
    double-buffered feature tiles and the resident f32 output / target blocks."""
    hw128 = _round_up(hw, 128)
    resident = (4 if with_target else 2) * tm * bf * 4          # G out (+ target), double-buffered
    per_col = 2 * ((tm + bf) if two_inputs else bf) * itemsize  # double-buffered K tiles
    cap = 8192 if itemsize >= 4 else 16384
    budget_cols = max(128, (_TILE_BUDGET_BYTES - resident) // per_col)
    tk = max(128, min(cap, hw128, (budget_cols // 128) * 128))
    if max_tk is not None:
        tk = max(128, min(tk, (max_tk // 128) * 128))
    # Prefer a tile that divides the 128-padded width exactly (avoids a large
    # zero-pad copy of the features) as long as it stays reasonably big.
    if hw128 % tk != 0:
        for cand in range(tk - 128, max(1024, tk // 2) - 1, -128):
            if hw128 % cand == 0:
                tk = cand
                break
    return tk, _round_up(hw, tk)


def _make_gram_kernel(inv_norm, with_target, two_inputs):
    """Build the kernel body. Ref order: [x_rows, (x_all), (target), G, (partial)]."""

    def kernel(*refs):
        refs = list(refs)
        xl_ref = refs.pop(0)                              # (tm, tk) row strip of F
        xr_ref = refs.pop(0) if two_inputs else xl_ref    # (bf, tk) all rows of F
        tgt_ref = refs.pop(0) if with_target else None    # (tm, bf) target strip
        g_ref = refs.pop(0)                               # (tm, bf) f32, resident over k
        part_ref = refs.pop(0) if with_target else None   # (1, 1, 1) partial SSE

        k = pl.program_id(1)

        @pl.when(k == 0)
        def _():
            g_ref[...] = jnp.zeros_like(g_ref)

        # NT-form matmul on the MXU in the native input dtype, f32 accumulation
        # directly into the resident output block (no scratch, no explicit .T).
        xl = xl_ref[...]
        xr = xl if xr_ref is xl_ref else xr_ref[...]
        g_ref[...] += lax.dot_general(xl, xr, _NT_DIMS,
                                      preferred_element_type=jnp.float32)

        @pl.when(k == pl.num_programs(1) - 1)
        def _():
            g = g_ref[...] * inv_norm
            g_ref[...] = g
            if with_target:
                d = g - tgt_ref[...].astype(jnp.float32)
                part_ref[0, 0, 0] = jnp.sum(d * d)

    return kernel


def _gram_pallas(features, norm, target_gram=None, *, max_tk=None):
    """features: (BF, HW). Returns G, or (G, mse_loss) if target_gram is given."""
    bf, hw = features.shape
    with_target = target_gram is not None
    tm = _pick_tm(bf)
    n_i = bf // tm
    two_inputs = n_i > 1
    itemsize = jnp.dtype(features.dtype).itemsize
    tk, hw_pad = _pick_tk(bf, tm, hw, itemsize, with_target, two_inputs, max_tk)
    if hw_pad != hw:
        # zero columns contribute nothing to F @ F.T; norm uses the original HW
        features = jnp.pad(features, ((0, 0), (0, hw_pad - hw)))
    n_k = hw_pad // tk

    kernel = _make_gram_kernel(1.0 / float(norm), with_target, two_inputs)

    in_specs = [pl.BlockSpec((tm, tk), lambda i, k: (i, k))]
    inputs = [features]
    if two_inputs:
        in_specs.append(pl.BlockSpec((bf, tk), lambda i, k: (0, k)))
        inputs.append(features)
    if with_target:
        in_specs.append(pl.BlockSpec((tm, bf), lambda i, k: (i, 0)))
        inputs.append(target_gram)

    g_spec = pl.BlockSpec((tm, bf), lambda i, k: (i, 0))
    if with_target:
        out_shape = (jax.ShapeDtypeStruct((bf, bf), jnp.float32),
                     jax.ShapeDtypeStruct((n_i, 1, 1), jnp.float32))
        out_specs = (g_spec, pl.BlockSpec((1, 1, 1), lambda i, k: (i, 0, 0)))
    else:
        out_shape = jax.ShapeDtypeStruct((bf, bf), jnp.float32)
        out_specs = g_spec

    result = pl.pallas_call(
        kernel,
        out_shape=out_shape,
        grid_spec=pltpu.PrefetchScalarGridSpec(
            num_scalar_prefetch=0,
            grid=(n_i, n_k),
            in_specs=in_specs,
            out_specs=out_specs,
        ),
        compiler_params=pltpu.CompilerParams(
            dimension_semantics=("parallel", "arbitrary"),  # rows parallel (v7x), K reduction
            vmem_limit_bytes=_VMEM_LIMIT_BYTES,
        ),
    )(*inputs)

    if with_target:
        g, partials = result
        loss = jnp.sum(partials) / jnp.float32(bf * bf)     # MSE over all BF^2 entries
        return g, loss
    return result


def _flatten_nchw(x):
    b, c, h, w = x.shape
    return x.reshape(b * c, h * w), b * c * h * w


def gram_matrix_pallas(x, *, max_tk=None):
    """gram_matrix(x) for NCHW x — Gram-only kernel variant (no target / loss)."""
    feats, norm = _flatten_nchw(x)
    return _gram_pallas(feats, norm, max_tk=max_tk)


class StyleLoss:
    """JAX/Pallas port of the PyTorch StyleLoss module.

    __call__(x) returns x unchanged; mse(gram(x), target) is stored in .loss,
    matching the PyTorch module's forward semantics.
    """

    def __init__(self, target_feature):
        # target Gram matrix is a detached constant in torch; plain array here
        self.target = gram_matrix_pallas(target_feature)
        self.loss = None

    def __call__(self, x):
        feats, norm = _flatten_nchw(x)
        _, loss = _gram_pallas(feats, norm, self.target)
        self.loss = loss
        return x


if __name__ == "__main__":
    key = jax.random.PRNGKey(0)
    k1, k2, k3 = jax.random.split(key, 3)

    def gram_ref(t):
        b, c, h, w = t.shape
        f = t.reshape(b * c, h * w).astype(jnp.float32)
        return (f @ f.T) / (b * c * h * w)

    # --- primary check: module-consistent small shapes -----------------------
    B, C, H, W = 2, 4, 16, 16
    target_feature = jax.random.normal(k1, (B, C, H, W), jnp.float32)
    x = jax.random.normal(k2, (B, C, H, W), jnp.float32)

    style_loss = StyleLoss(target_feature)
    out = style_loss(x)
    loss = style_loss.loss
    jax.block_until_ready((out, loss))

    G_tgt_ref = gram_ref(target_feature)
    G_ref = gram_ref(x)
    loss_ref = jnp.mean((G_ref - G_tgt_ref) ** 2)

    assert out.shape == x.shape and jnp.allclose(out, x)
    assert jnp.allclose(style_loss.target, G_tgt_ref, rtol=1e-5, atol=1e-5)
    assert jnp.allclose(loss, loss_ref, rtol=1e-5, atol=1e-6)

    # --- secondary check: forced small K tile -> multi-step K reduction, plus
    #     zero-padding of a non-multiple-of-128 spatial extent -----------------
    x2 = jax.random.normal(k3, (2, 4, 16, 12), jnp.float32)
    g2 = gram_matrix_pallas(x2, max_tk=128)          # n_k = 2, HW padded 192 -> 256
    jax.block_until_ready(g2)
    assert jnp.allclose(g2, gram_ref(x2), rtol=1e-4, atol=1e-5)

    f2, n2 = _flatten_nchw(x2)
    _, loss2 = _gram_pallas(f2, n2, G_tgt_ref, max_tk=128)
    jax.block_until_ready(loss2)
    loss2_ref = jnp.mean((gram_ref(x2) - G_tgt_ref) ** 2)
    assert jnp.allclose(loss2, loss2_ref, rtol=1e-4, atol=1e-6)

    print("KERNEL_OK")
</pallas_src>

<mosaic_0001>
module attributes {stable_mosaic.version = 11 : i64} {
  func.func @kernel(%arg0: i32, %arg1: i32, %arg2: memref<8x256xf32, #tpu.memory_space<vmem>>, %arg3: memref<8x8xf32, #tpu.memory_space<vmem>>) attributes {dimension_semantics = [#tpu.dimension_semantics<parallel>, #tpu.dimension_semantics<arbitrary>], iteration_bounds = array<i64: 1, 1>, scalar_prefetch = 0 : i64, scratch_operands = 0 : i64, tpu.core_type = #tpu.core_type<tc>, window_params = [{transform_indices = @transform_0, window_bounds = array<i64: 8, 256>}, {transform_indices = @transform_1, window_bounds = array<i64: 8, 8>}]} {
    %c0_i32 = arith.constant 0 : i32
    %0 = arith.cmpi eq, %arg1, %c0_i32 : i32
    %1 = arith.extui %0 : i1 to i32
    %c0_i32_0 = arith.constant 0 : i32
    %2 = arith.cmpi ne, %1, %c0_i32_0 : i32
    scf.if %2 {
      %cst_8 = arith.constant 0.000000e+00 : f32
      %11 = vector.broadcast %cst_8 : f32 to vector<8x8xf32>
      %c0_9 = arith.constant 0 : index
      %c0_10 = arith.constant 0 : index
      %12 = vector.load %arg3[%c0_9, %c0_10] : memref<8x8xf32, #tpu.memory_space<vmem>>, vector<8x8xf32>
      tpu.vector_store %arg3[%c0_9, %c0_10], %11 {strides = array<i32>} : memref<8x8xf32, #tpu.memory_space<vmem>>, vector<8x8xf32>,
    } else {
    }
    %c0 = arith.constant 0 : index
    %c0_1 = arith.constant 0 : index
    %3 = vector.load %arg2[%c0, %c0_1] : memref<8x256xf32, #tpu.memory_space<vmem>>, vector<8x256xf32>
    %c0_2 = arith.constant 0 : index
    %c0_3 = arith.constant 0 : index
    %4 = vector.load %arg3[%c0_2, %c0_3] : memref<8x8xf32, #tpu.memory_space<vmem>>, vector<8x8xf32>
    %cst = arith.constant dense<0.000000e+00> : vector<8x8xf32>
    %5 = tpu.matmul %3, %3, %cst {dimension_numbers = #tpu.dot_dimension_numbers<[1], [1], [0], [0], [0, 0, 1, 0], [], []>} : vector<8x256xf32>, vector<8x256xf32>, vector<8x8xf32> -> vector<8x8xf32>
    %6 = arith.addf %4, %5 : vector<8x8xf32>
    %c0_4 = arith.constant 0 : index
    %c0_5 = arith.constant 0 : index
    %7 = vector.load %arg3[%c0_4, %c0_5] : memref<8x8xf32, #tpu.memory_space<vmem>>, vector<8x8xf32>
    tpu.vector_store %arg3[%c0_4, %c0_5], %6 {strides = array<i32>} : memref<8x8xf32, #tpu.memory_space<vmem>>, vector<8x8xf32>,
    %c0_i32_6 = arith.constant 0 : i32
    %8 = arith.cmpi eq, %arg1, %c0_i32_6 : i32
    %9 = arith.extui %8 : i1 to i32
    %c0_i32_7 = arith.constant 0 : i32
    %10 = arith.cmpi ne, %9, %c0_i32_7 : i32
    scf.if %10 {
      %c0_8 = arith.constant 0 : index
      %c0_9 = arith.constant 0 : index
      %11 = vector.load %arg3[%c0_8, %c0_9] : memref<8x8xf32, #tpu.memory_space<vmem>>, vector<8x8xf32>
      %cst_10 = arith.constant 4.8828125E-4 : f32
      %12 = vector.broadcast %cst_10 : f32 to vector<8x8xf32>
      %13 = arith.mulf %11, %12 : vector<8x8xf32>
      %c0_11 = arith.constant 0 : index
      %c0_12 = arith.constant 0 : index
      %14 = vector.load %arg3[%c0_11, %c0_12] : memref<8x8xf32, #tpu.memory_space<vmem>>, vector<8x8xf32>
      tpu.vector_store %arg3[%c0_11, %c0_12], %13 {strides = array<i32>} : memref<8x8xf32, #tpu.memory_space<vmem>>, vector<8x8xf32>,
    } else {
    }
    return
  }
  func.func @transform_0(%arg0: i32, %arg1: i32) -> (i32, i32) {
    %c0_i32 = arith.constant 0 : i32
    return %arg0, %arg1 : i32, i32
  }
  func.func @transform_1(%arg0: i32, %arg1: i32) -> (i32, i32) {
    %c0_i32 = arith.constant 0 : i32
    %c0_i32_0 = arith.constant 0 : i32
    return %arg0, %c0_i32 : i32, i32
  }
}

</mosaic_0001>

<bundles_post_ra>
// kernel: tpu_custom_call.1
= control target key start
LH: loop header
LB: loop body
LE: loop exit
PB: predicated region body
PF: predicated region fallthrough
CT: control target
= control target key end

     0   :  { %6 = vsyncpa [#allocation3], 0  ;;  %s215_s0 = inlined_call_operand.hbm [shape: f32[8,256], index: 0, kind: input, shape index: {}]   ;;  %s216_s1 = inlined_call_operand.hbm [shape: f32[8,8], index: 1, kind: output, shape index: {}]  }
   0x1   :  { %7 = vsyncpa [#allocation4], 0  ;;  %s175_s6 = smov [#allocation2]   ;;  %s127_s10 = scalar_lea.hbm %s215_s0, 256 }
   0x2   :  { %s14_s7 = sshll.u32 %s175_s6, 4  ;;  %p128_p0 = scmp.ne.s32.totalorder %s215_s0, %s127_s10  ;;  %s15_s7 = int_to_ptr.vmem [resolvable:$true] %s14_s7 }
   0x3   :  { %p131_p1 = scmp.lt.u32.totalorder %s127_s10, %s215_s0 }
   0x5   :  { %p133_p2 = pnand %p131_p1, %p128_p0 }
   0x7   :  { %136 = shalt.err (!%p133_p2)
}
   0x8   :  { %s137_s15 = scalar_lea.vmem %s15_s7, 256  ;;  %p142_p4 = scmp.lt.s32.totalorder %s15_s7, %s15_s7 }
   0x9   :  { %p138_p3 = scmp.ne.s32.totalorder %s15_s7, %s137_s15  ;;  %p143_p5 = scmp.lt.s32.totalorder %s137_s15, %s137_s15 }
   0xb   :  { %p144_p6 = por %p143_p5, %p142_p4 }
   0xd   :  { %p145_p7 = pnand %p144_p6, %p138_p3 }
   0xf   :  { %148 = shalt.err (!%p145_p7)
}
  0x10   :  { %17 = dma.hbm_to_vmem [thread:$0]  %s215_s0, 256, %s15_s7, [#allocation3]  }
  0x11   :  { %171 = dma.done.wait [#allocation3], 256  }
  0x12   :  { %172 = vsyncadd [#allocation3], 4294967040  ;;  %vm25_vm0 = vcmask 64512   ;;  %v176_v0 = vmov 0.0   ;;  %v28_v1 = vld [vmem:[#allocation2 + $0x8] sm:$0xff]  ;;  %v27_v2 = vld [vmem:[#allocation2] sm:$0xff] }
  0x13   :  { %26 = vst.msk [vmem:[#allocation5] sm:$0xff] %vm25_vm0, %v176_v0  ;;  %30 = vmatprep.subr.mxu0 %v28_v1  ;;  %94 = vmatprep.mubr.f32.mxu0 %v28_v1  ;;  %s177_s18 = smov [#allocation5]  }
  0x14   :  { %31 = vmatpush1.xpose.msra.mxu0 %v27_v2  ;;  %s115_s0 = sshll.u32 %s177_s18, 4  ;;  %s116_s0 = int_to_ptr.vmem [resolvable:$true] %s115_s0 }
  0x15   :  { %s149_s19 = scalar_lea.vmem %s116_s0, 128  ;;  %p154_p9 = scmp.lt.s32.totalorder %s116_s0, %s116_s0 }
  0x16   :  { %p150_p8 = scmp.ne.s32.totalorder %s116_s0, %s149_s19  ;;  %p155_p10 = scmp.lt.s32.totalorder %s149_s19, %s149_s19 }
  0x17   :  { %95 = vmatmul.mubr.f32.vlgmr.msra.gmra.mrb[0].mxu0 %v27_v2 }
  0x18   :  { %p156_p11 = por %p155_p10, %p154_p9 }
  0x1a   :  { %v29_v3 = vld [vmem:[#allocation5] sm:$0xff]  ;;  %p157_p12 = pnand %p156_p11, %p150_p8 }
  0xea   :  { %v96_v4 = vpop.f32.mrb[0].mxu0 }
  0xeb   :  { %v100_v5 = vadd.f32 %v96_v4, %v29_v3  ;;  %v98_v6 = vpop.f32.mrb[1].mxu0 }
  0xed   :  { %102 = vst.msk [vmem:[#allocation5] sm:$0xff] %vm25_vm0, %v100_v5 }
  0xf4   :  { %v106_v7 = vld [vmem:[#allocation5] sm:$0xff] }
  0xf5   :  { %v107_v8 = vmul.f32 0.00048828125, %v106_v7 }
  0xf7   :  { %108 = vst.msk [vmem:[#allocation5] sm:$0xff] %vm25_vm0, %v107_v8 }
  0xf8   :  { %160 = shalt.err (!%p157_p12)
}
  0xf9   :  { %s161_s22 = scalar_lea.hbm %s216_s1, 128 }
  0xfa   :  { %p162_p13 = scmp.ne.s32.totalorder %s216_s1, %s161_s22  ;;  %p165_p0 = scmp.lt.u32.totalorder %s161_s22, %s216_s1 }
  0xfc   :  { %p167_p1 = pnand %p165_p0, %p162_p13 }
  0xfe   :  { %170 = shalt.err (!%p167_p1)
}
  0xff   :  { %118 = dma.vmem_to_hbm [thread:$0]  %s116_s0, 128, %s216_s1, [#allocation4]  }
 0x100   :  { %173 = dma.done.wait [#allocation4], 128  }
 0x101   :  { %174 = vsyncadd [#allocation4], 4294967168 }
 0x102   :  { %122 = vsyncpa [#allocation3], 1 }
 0x103   :  { %123 = vsyncpa [#allocation4], 1 }

</bundles_post_ra>
